<compile_context>
chip_gen: v7x
topology: tpu7x:2x2x1
jax: 0.10.0
libtpu: 0.0.40
codegen_flags: <defaults>
</compile_context>

<pallas_src>
import numpy as np
import jax
import jax.numpy as jnp
from jax.experimental import pallas as pl
from jax.experimental.pallas import tpu as pltpu


def _round_down(x, m):
    return (x // m) * m


def _round_up(x, m):
    return ((x + m - 1) // m) * m


def _node_projection_kernel(nf_ref, w2_ref, proj_ref):
    # nf_ref:   [TN, F] tile of node_features
    # w2_ref:   [2, F]  fused Linear(2F->1) weight row
    #                   (row 0 = source half, row 1 = target half), resident
    # proj_ref: [TN, 2] per-node projections (col 0 -> source, col 1 -> target)
    nf = nf_ref[...]
    w2 = w2_ref[...]
    # Exact-f32 VPU multiply + XLU lane reduce (same per-half summation as the
    # reference; no MXU, so no bf16-pass precision surprises). The kernel is
    # HBM-bound, so the reduces ride in XLU/VALU slack.
    ps = jnp.sum(nf * w2[0:1, :], axis=-1, keepdims=True)   # [TN, 1]
    pt = jnp.sum(nf * w2[1:2, :], axis=-1, keepdims=True)   # [TN, 1]
    # Single fused [TN, 2] store: one output DMA per tile, half the masked vst
    # ops of two separate (TN, 1) outputs.
    proj_ref[...] = jnp.concatenate([ps, pt], axis=-1)


def linear_regression_baseline(node_features, source_nodes, target_nodes,
                               weight, bias):
    """node_features: [N, F] f32, source/target_nodes: [B] int32,
    weight: [1, 2F] f32 (nn.Linear layout), bias: [1] f32 -> returns [B] f32."""
    N, F = node_features.shape

    node_features = node_features.astype(jnp.float32)
    weight = weight.astype(jnp.float32)
    bias = bias.astype(jnp.float32)
    w2 = weight.reshape(2, F)            # row 0 = w_s, row 1 = w_t

    # ---- Stage-1 tile sizing (lane-padding-aware VMEM budget) ----
    # Double-buffered node_features tile: 2 * tn * round_up(F,128) * 4 bytes.
    # Double-buffered (tn, 2) output tile pads its lane dim to 128:
    #   2 * tn * 128 * 4 bytes.
    # Keep the total under ~24 MiB so it clears v7x's 32 MiB scoped VMEM
    # (64 MiB physical) with headroom; v5e/v6e (128 MiB physical) have slack.
    f_pad = _round_up(F, 128)
    bytes_per_row = 2 * f_pad * 4 + 2 * 128 * 4
    budget_bytes = 24 * 1024 * 1024
    tn = _round_down(budget_bytes // bytes_per_row, 8)
    tn = max(8, min(16384, tn))
    if N <= tn:
        # Whole array fits one tile: split into >= 2 tiles so the second v7x
        # TensorCore gets work (no effect on single-TC v5e/v6e). Fall back to
        # a single full-array tile only when N is too small to split on the
        # 8-row sublane granularity (block dim == full array dim is legal).
        half = _round_down((N + 1) // 2, 8)
        tn = half if half >= 8 else N
    grid_n = ((N + tn - 1) // tn,)       # partial last tile is write-masked

    proj = pl.pallas_call(
        _node_projection_kernel,
        out_shape=jax.ShapeDtypeStruct((N, 2), jnp.float32),
        grid=grid_n,
        in_specs=[
            pl.BlockSpec((tn, F), lambda i: (i, 0)),   # streamed node tile
            pl.BlockSpec((2, F), lambda i: (0, 0)),    # fused weights, resident
        ],
        out_specs=pl.BlockSpec((tn, 2), lambda i: (i, 0)),
        compiler_params=pltpu.CompilerParams(
            dimension_semantics=("parallel",),          # megacore on v7x
            vmem_limit_bytes=32 * 1024 * 1024,
        ),
    )(node_features, w2)

    # ---- Epilogue: O(B) gather + bias, left to XLA so it fuses with the
    # gathers (no separate pallas_call launch / extra HBM round-trips).
    # TODO(synk): no clean in-kernel dynamic gather on TPU; jnp.take also
    # clips out-of-range indices silently (PyTorch would raise).
    ps = proj[:, 0]
    pt = proj[:, 1]
    y = (jnp.take(ps, source_nodes, axis=0)
         + jnp.take(pt, target_nodes, axis=0)
         + bias[0])
    return y                              # .view(-1) -> already [B]


def reference(node_features, source_nodes, target_nodes, weight, bias):
    # Exact-f32 elementwise reference (matches PyTorch f32 Linear semantics
    # without relying on XLA's default TPU matmul precision).
    flow = jnp.concatenate(
        [jnp.take(node_features, source_nodes, axis=0),
         jnp.take(node_features, target_nodes, axis=0)], axis=1)   # [B, 2F]
    return jnp.sum(flow * weight[0], axis=-1) + bias[0]


if __name__ == "__main__":
    key = jax.random.PRNGKey(0)
    k_feat, k_src, k_tgt, k_w, k_b = jax.random.split(key, 5)

    num_nodes, num_features = 16, 32   # features: np.ndarray [N, F]
    batch = 8                          # number of (source, target) edges

    # Deterministic "features" array (what __init__ receives); no normalization.
    node_features = jax.random.normal(k_feat, (num_nodes, num_features),
                                      dtype=jnp.float32)
    # (features_mean / features_std are computed in __init__ but unused in
    #  forward when normalize_features=False.)
    _features_mean = jnp.mean(node_features, axis=0)
    _features_std = jnp.std(node_features, axis=0)

    # Deterministic nn.Linear(2F, 1) parameters (synthetic init, no checkpoint).
    bound = 1.0 / np.sqrt(2 * num_features)
    weight = jax.random.uniform(k_w, (1, 2 * num_features),
                                minval=-bound, maxval=bound,
                                dtype=jnp.float32)
    bias = jax.random.uniform(k_b, (1,), minval=-bound, maxval=bound,
                              dtype=jnp.float32)

    source_nodes = jax.random.randint(k_src, (batch,), 0, num_nodes,
                                      dtype=jnp.int32)
    target_nodes = jax.random.randint(k_tgt, (batch,), 0, num_nodes,
                                      dtype=jnp.int32)

    y = linear_regression_baseline(node_features, source_nodes, target_nodes,
                                   weight, bias)
    y = jax.block_until_ready(y)

    y_ref = reference(node_features, source_nodes, target_nodes, weight, bias)
    np.testing.assert_allclose(np.asarray(y), np.asarray(y_ref),
                               rtol=1e-5, atol=1e-5)
    assert y.shape == (batch,)
    print("KERNEL_OK")
</pallas_src>

<mosaic_0001>
module attributes {stable_mosaic.version = 11 : i64} {
  func.func @_node_projection_kernel(%arg0: i32, %arg1: memref<8x32xf32, #tpu.memory_space<vmem>>, %arg2: memref<2x32xf32, #tpu.memory_space<vmem>>, %arg3: memref<8x2xf32, #tpu.memory_space<vmem>>) attributes {dimension_semantics = [#tpu.dimension_semantics<parallel>], iteration_bounds = array<i64: 2>, scalar_prefetch = 0 : i64, scratch_operands = 0 : i64, tpu.core_type = #tpu.core_type<tc>, window_params = [{transform_indices = @transform_0, window_bounds = array<i64: 8, 32>}, {pipeline_mode = #tpu.pipeline_mode<synchronous>, transform_indices = @transform_1, window_bounds = array<i64: 2, 32>}, {transform_indices = @transform_2, window_bounds = array<i64: 8, 2>}]} {
    %c0 = arith.constant 0 : index
    %c0_0 = arith.constant 0 : index
    %0 = vector.load %arg1[%c0, %c0_0] : memref<8x32xf32, #tpu.memory_space<vmem>>, vector<8x32xf32>
    %c0_1 = arith.constant 0 : index
    %c0_2 = arith.constant 0 : index
    %1 = vector.load %arg2[%c0_1, %c0_2] : memref<2x32xf32, #tpu.memory_space<vmem>>, vector<2x32xf32>
    %2 = vector.extract_strided_slice %1 {offsets = [0, 0], sizes = [1, 32], strides = [1, 1]} : vector<2x32xf32> to vector<1x32xf32>
    %3 = vector.broadcast %2 : vector<1x32xf32> to vector<8x32xf32>
    %4 = arith.mulf %0, %3 : vector<8x32xf32>
    %cst = arith.constant dense<0.000000e+00> : vector<8xf32>
    %5 = vector.multi_reduction <add>, %4, %cst [1] : vector<8x32xf32> to vector<8xf32>
    %6 = vector.shape_cast %5 : vector<8xf32> to vector<8x1xf32>
    %7 = vector.extract_strided_slice %1 {offsets = [1, 0], sizes = [1, 32], strides = [1, 1]} : vector<2x32xf32> to vector<1x32xf32>
    %8 = vector.broadcast %7 : vector<1x32xf32> to vector<8x32xf32>
    %9 = arith.mulf %0, %8 : vector<8x32xf32>
    %cst_3 = arith.constant dense<0.000000e+00> : vector<8xf32>
    %10 = vector.multi_reduction <add>, %9, %cst_3 [1] : vector<8x32xf32> to vector<8xf32>
    %11 = vector.shape_cast %10 : vector<8xf32> to vector<8x1xf32>
    %12 = tpu.concatenate %6, %11 in 1 : vector<8x1xf32>, vector<8x1xf32> -> vector<8x2xf32>
    %c0_4 = arith.constant 0 : index
    %c0_5 = arith.constant 0 : index
    %13 = vector.load %arg3[%c0_4, %c0_5] : memref<8x2xf32, #tpu.memory_space<vmem>>, vector<8x2xf32>
    tpu.vector_store %arg3[%c0_4, %c0_5], %12 {strides = array<i32>} : memref<8x2xf32, #tpu.memory_space<vmem>>, vector<8x2xf32>,
    return
  }
  func.func @transform_0(%arg0: i32) -> (i32, i32) {
    %c0_i32 = arith.constant 0 : i32
    %c0_i32_0 = arith.constant 0 : i32
    return %arg0, %c0_i32 : i32, i32
  }
  func.func @transform_1(%arg0: i32) -> (i32, i32) {
    %c0_i32 = arith.constant 0 : i32
    %c0_i32_0 = arith.constant 0 : i32
    %c0_i32_1 = arith.constant 0 : i32
    return %c0_i32, %c0_i32_0 : i32, i32
  }
  func.func @transform_2(%arg0: i32) -> (i32, i32) {
    %c0_i32 = arith.constant 0 : i32
    %c0_i32_0 = arith.constant 0 : i32
    return %arg0, %c0_i32 : i32, i32
  }
}

</mosaic_0001>

<bundles_post_ra>
// kernel: tpu_custom_call.1
= control target key start
LH: loop header
LB: loop body
LE: loop exit
PB: predicated region body
PF: predicated region fallthrough
CT: control target
= control target key end

     0   :  { %7 = vsyncpa [#allocation3], 0  ;;  %s488_s0 = inlined_call_operand.hbm [shape: f32[16,32], index: 0, kind: input, shape index: {}]   ;;  %s489_s1 = inlined_call_operand.vmem [shape: f32[2,32], index: 1, kind: input, shape index: {}]   ;;  %s490_s2 = inlined_call_operand.vmem [shape: f32[16,2], index: 2, kind: output, shape index: {}]  }
   0x1   :  { %9 = vsyncpa [#allocation3 + $0x1], 0  ;;  %s378_s9 = smov 0   ;;  %s380_s10 = smov 0  }
   0x2   :  { %s382_s11 = smov 0   ;;  %s384_s12 = smov 0  }
   0x3 LB: > { %s397_s13 = sadd.s32 4294967295, %s360_s12   ;;  %s400_s14 = sadd.s32 1, %s360_s12   ;;  %s360_s12 = sphi %s384_s12, %s498_s12   ;;  %s356_s11 = sphi %s382_s11, %s497_s11   ;;  %s352_s10 = sphi %s380_s10, %s496_s10   ;;  %s348_s9 = sphi %s378_s9, %s495_s9  }
   0x4   : > { %s19_s15 = ssub.s32 %s360_s12, %s400_s14  ;;  %s22_s16 = sadd.s32 1, %s356_s11 }
   0x5   : > { %p20_p0 = scmp.eq.s32.totalorder %s19_s15, 0  ;;  %p29_p1 = scmp.ne.s32.totalorder %s356_s11, %s352_s10 }
   0x6   : > { %p30_p2 = scmp.eq.s32.totalorder %s360_s12, 0  ;;  %p35_p3 = scmp.ne.s32.totalorder %s352_s10, %s348_s9 }
   0x7   : > { %s410_s17 = scalar_select %p20_p0, %s356_s11, %s22_s16  }
   0x8   : > { %p31_p4 = por %p30_p2, %p29_p1  ;;  %p36_p5 = scmp.eq.s32.totalorder %s397_s13, 0 }
   0x9   : > { %p263_p6 = scmp.lt.s32.totalorder %s360_s12, 2  ;;  %s109_s19 = sand.u32 1, %s356_s11  }
   0xa   : > { %p414_p7 = por %p36_p5, %p35_p3  ;;  %s250_s20 = sshll.u32 %s109_s19, 3 }
   0xb   : > { %s251_s21 = sshll.u32 %s360_s12, 7  ;;  %s113_s25 = scalar_lea.vmem [#allocation2], %s250_s20 }
   0xc   : > { %s423_s24 = scalar_lea.hbm %s488_s0, %s251_s21  ;;  %s120_s26 = sshll.u32 %s113_s25, 4  ;;  %s425_s26 = int_to_ptr.vmem [resolvable:$true] %s120_s26 }
   0xd   : > { %p427_p8 = pnand %p263_p6, %p31_p4  ;;  %s110_s28 = scalar_lea.sflag [#allocation3], %s109_s19 }
   0xe   : > { %s296_s29 = scalar_lea.hbm %s423_s24, 128  ;;  %s301_s4 = scalar_lea.hbm %s488_s0, 256 }
   0xf   : > { %p297_p11 = scmp.ne.s32.totalorder %s423_s24, %s296_s29  ;;  %p298_p12 = pneg %p427_p8 }
  0x10   : > { %p302_p1 = scmp.lt.u32.totalorder %s423_s24, %s488_s0  ;;  %p303_p2 = scmp.lt.u32.totalorder %s301_s4, %s296_s29 }
  0x11   : > { %p299_p13 = pnand %p298_p12, %p297_p11  ;;  %p305_p4 = scmp.lt.u32.totalorder %s296_s29, %s423_s24 }
  0x12   : > { %p304_p3 = por %p303_p2, %p302_p1 }
  0x13   : > { %p300_p0 = pneg %p299_p13 }
  0x14   : > { %p306_p5 = por %p305_p4, %p304_p3 }
  0x16   : > { %p307_p6 = pnand %p306_p5, %p300_p0 }
  0x18   : > { %310 = shalt.err (!%p307_p6)
}
  0x19   : > { %s311_s7 = scalar_lea.vmem %s425_s26, 128  ;;  %s362_s8 = smov [#allocation2]  }
  0x1a   : > { %p312_p11 = scmp.ne.s32.totalorder %s425_s26, %s311_s7  ;;  %s316_s9 = sshll.u32 %s362_s8, 4  ;;  %s317_s9 = int_to_ptr.vmem [resolvable:$false] %s316_s9 }
  0x1b   : > { %s318_s15 = scalar_lea.vmem %s317_s9, 256  ;;  %p319_p10 = scmp.lt.s32.totalorder %s425_s26, %s317_s9 }
  0x1c   : > { %p314_p13 = pnand %p312_p11, %p298_p12  ;;  %p320_p1 = scmp.lt.s32.totalorder %s318_s15, %s311_s7 }
  0x1e   : > { %p315_p9 = pneg %p314_p13  ;;  %p321_p2 = por %p320_p1, %p319_p10 }
  0x20   : > { %p322_p3 = pnand %p321_p2, %p315_p9 }
  0x22   : > { %325 = shalt.err (!%p322_p3)
}
  0x23   : > { %262 = dma.hbm_to_vmem [thread:$0]  (!%p427_p8), %s423_s24, 128, %s425_s26, %s110_s28  }
  0x24   : > { %p493_p0 = scmp.lt.s32.totalorder %s360_s12, 3  ;;  %p494_p4 = scmp.ge.s32.totalorder %s360_s12, 1 }
  0x26   : > { %p126_p12 = pnand %p494_p4, %p493_p0 }
  0x27   : > { %s131_s16 = sand.u32 (!%p126_p12), 1, %s352_s10  }
  0x28   : > { %129 = sbr.rel (%p126_p12) target bundleno = 207 (0xcf), region = 28  ;;  %s253_s19 = sshll.u32 (!%p126_p12), %s131_s16, 3 }
  0x29   : > { %s132_s20 = scalar_lea.sflag (!%p126_p12), [#allocation3], %s131_s16  ;;  %s135_s21 = scalar_lea.vmem (!%p126_p12), [#allocation2], %s253_s19 }
  0x2f   : > { %343 = dma.done.wait (%p414_p7), %s132_s20, 128  }
  0x30   : > { %345 = vsyncadd (%p414_p7), %s132_s20, 4294967168  ;;  %v161_v0 = vlaneseq  ;;  %v159_v4 = vld [vmem:[%s135_s21] sm:$0xff]  ;;  %vm166_vm0 = vcmask 261120   ;;  %p155_p7 = scmp.lt.s32.totalorder %s397_s13, 1  ;;  %vm178_vm1 = vcmask 7168   ;;  %vm180_vm2 = vcmask 15360  }
  0x31   : > { %v160_v5 = vld [vmem:[%s489_s1] sm:$0x3] }
  0x32   : > { %v162_v1 = vshrl.u32 %v161_v0, 7  ;;  %s500_s13 = smov (!%p155_p7, %s397_s13), 1 }
  0x33   : > { %s254_s18 = sshll.u32 %s500_s13, 3 }
  0x34   : > { %v163_v2 = vsub.s32 0, %v162_v1  ;;  %v172_v3 = vsub.s32 1, %v162_v1  ;;  %s158_s25 = scalar_lea.vmem %s490_s2, %s254_s18 }
  0x36   : > { %v164_v6 = vrot.slane %v160_v5, %v163_v2  ;;  %v173_v7 = vrot.slane %v160_v5, %v172_v3 }
  0x38   : > { %v165_v8 = vmul.f32 %v164_v6, %v159_v4  ;;  %v174_v9 = vmul.f32 %v173_v7, %v159_v4 }
  0x3a   : > { %v167_v10 = vsel %vm166_vm0, %v165_v8, 0.0  ;;  %v175_v11 = vsel %vm166_vm0, %v174_v9, 0.0 }
  0x3b   : > { %168 = vadd.xlane.f32.xlu0 %v167_v10 }
  0x3f   : > { %176 = vadd.xlane.f32.xlu0 %v175_v11 }
  0xc8   : > { %v169_v12 = vpop.xlane.xlu0 %168 }
  0xcc   : > { %v177_v13 = vpop.xlane.xlu0 %176 }
  0xcd   : > { %v179_v14 = vsel %vm178_vm1, %v169_v12, %v177_v13 }
  0xce   : > { %181 = vst.msk [vmem:[%s158_s25] sm:$0xff] %vm180_vm2, %v179_v14 }
  0xcf PF: > { %p12_p8 = scmp.ge.s32.totalorder %s400_s14, 4   ;;  %s495_s9 = smov %s352_s10 }
  0xd0   : > { %s496_s10 = smov %s356_s11  ;;  %s497_s11 = smov %s410_s17 }
  0xd1   : > { %s498_s12 = smov %s400_s14  ;;  %14 = sbr.rel (!%p12_p8) target bundleno = 3 (0x3), region = 68 }
  0xd8   :  { %201 = vsyncpa [#allocation3], 1 }
  0xd9   :  { %203 = vsyncpa [#allocation3 + $0x1], 1 }

</bundles_post_ra>
